<compile_context>
chip_gen: v7x
topology: tpu7x:2x2x1
jax: 0.10.0
libtpu: 0.0.40
codegen_flags: <defaults>
</compile_context>

<pallas_src>
import math

import jax
import jax.numpy as jnp
import numpy as np
from jax.experimental import pallas as pl
from jax.experimental.pallas import tpu as pltpu


# ---------------------------------------------------------------------------
# Host-side folding of (ReflectionPad + Conv(1,k) + bias) and (Conv 1x1 + bias)
# into dense matrices for the stacked layout  col = channel * Wh + w.
# ---------------------------------------------------------------------------

def _reflect_index(p, pad_left, size):
    """Source index of padded position p under ReflectionPad (no edge repeat)."""
    if p < pad_left:
        return pad_left - p
    q = p - pad_left
    if q < size:
        return q
    return 2 * size - 2 - q


def _fold_branch(w1, b1, w2, b2, wh):
    """Fold one P/U branch into (A, bias1, B, bias2).

    w1: (HC, C, 1, k), b1: (HC,), w2: (C, HC, 1, 1), b2: (C,)
    A:  (C*wh, HC*wh)   folded reflection-pad + (1,k) cross-correlation
    B:  (HC*wh, C*wh)   folded 1x1 conv = kron(w2.T, I_wh)
    """
    w1 = np.asarray(w1, np.float32)
    b1 = np.asarray(b1, np.float32)
    w2 = np.asarray(w2, np.float32)
    b2 = np.asarray(b2, np.float32)
    hc, ic, _, k = w1.shape
    pad_l = k // 2

    a = np.zeros((ic * wh, hc * wh), np.float32)
    for o in range(hc):
        for i in range(ic):
            for wout in range(wh):
                for j in range(k):
                    src = _reflect_index(wout + j, pad_l, wh)
                    a[i * wh + src, o * wh + wout] += w1[o, i, 0, j]
    bias1 = np.repeat(b1, wh)[None, :]                               # (1, HC*wh)

    b = np.kron(w2[:, :, 0, 0].T, np.eye(wh, dtype=np.float32))      # (HC*wh, C*wh)
    bias2 = np.repeat(b2, wh)[None, :]                               # (1, C*wh)
    return (jnp.asarray(a), jnp.asarray(bias1),
            jnp.asarray(b), jnp.asarray(bias2))


# ---------------------------------------------------------------------------
# Kernel: one tile of rows, full lifting step (4 MXU matmuls + elementwise).
# ---------------------------------------------------------------------------

def _lifting_kernel(x_ref,
                    au_ref, b1u_ref, bu_ref, b2u_ref,
                    ap_ref, b1p_ref, bp_ref, b2p_ref,
                    out_ref):
    cw = au_ref.shape[0]                         # C * Wh
    x = x_ref[...].astype(jnp.float32)           # (TR, 2*cw) = [even | odd]
    xe = x[:, :cw]
    xo = x[:, cw:]

    # c = x_even + U(x_odd)
    h = jnp.dot(xo, au_ref[...], preferred_element_type=jnp.float32) + b1u_ref[...]
    h = jnp.maximum(h, 0.0)                      # ReLU
    u = jnp.tanh(jnp.dot(h, bu_ref[...], preferred_element_type=jnp.float32)
                 + b2u_ref[...])
    c = xe + u

    # d = x_odd - P(c)
    h2 = jnp.dot(c, ap_ref[...], preferred_element_type=jnp.float32) + b1p_ref[...]
    h2 = jnp.maximum(h2, 0.0)
    p = jnp.tanh(jnp.dot(h2, bp_ref[...], preferred_element_type=jnp.float32)
                 + b2p_ref[...])
    d = xo - p

    out_ref[...] = jnp.concatenate([c, d], axis=-1).astype(out_ref.dtype)


# ---------------------------------------------------------------------------
# Wrapper
# ---------------------------------------------------------------------------

def _pick_block_rows(r):
    """Rows per grid step: as large as useful, 8-aligned, grid >= 2 if possible."""
    if r <= 8:
        return r
    half = max(8, (((r + 1) // 2) // 8) * 8)
    return min(half, 256)


def lifting_scheme(x, params, horizontal=True):
    """LiftingScheme forward (modified=True, splitting=True, simple_lifting=False).

    x: (N, C, H, W) NCHW.  params["U"/"P"] hold w1 (2C,C,1,k), b1, w2 (C,2C,1,1), b2.
    Returns (c, d), each (N, C, H, W//2) for horizontal (H//2 for vertical).
    """
    if not horizontal:                      # vertical lifting == transposed case
        x = jnp.swapaxes(x, 2, 3)

    n, ch, h, w = x.shape
    assert w % 2 == 0, "split axis must have even length"
    wh = w // 2
    cw = ch * wh

    a_u, b1_u, bm_u, b2_u = _fold_branch(params["U"]["w1"], params["U"]["b1"],
                                         params["U"]["w2"], params["U"]["b2"], wh)
    a_p, b1_p, bm_p, b2_p = _fold_branch(params["P"]["w1"], params["P"]["b1"],
                                         params["P"]["w2"], params["P"]["b2"], wh)
    weights = (a_u, b1_u, bm_u, b2_u, a_p, b1_p, bm_p, b2_p)

    # stride-2 split + restack: (N,C,H,W) -> rows = N*H, cols = C*Wh
    xe = jnp.transpose(x[:, :, :, 0::2], (0, 2, 1, 3)).reshape(n * h, cw)
    xo = jnp.transpose(x[:, :, :, 1::2], (0, 2, 1, 3)).reshape(n * h, cw)
    xin = jnp.concatenate([xe, xo], axis=-1)              # (R, 2*cw), lane-dense

    r = n * h
    tr = _pick_block_rows(r)
    num_blocks = pl.cdiv(r, tr)
    r_pad = num_blocks * tr
    if r_pad != r:
        xin = jnp.pad(xin, ((0, r_pad - r), (0, 0)))      # padded rows are zeros

    rowmap = lambda i: (i, 0)
    invmap = lambda i: (0, 0)                             # grid-invariant weights
    wspec = lambda arr: pl.BlockSpec(arr.shape, invmap)

    out = pl.pallas_call(
        _lifting_kernel,
        out_shape=jax.ShapeDtypeStruct((r_pad, 2 * cw), jnp.float32),
        grid_spec=pltpu.PrefetchScalarGridSpec(
            num_scalar_prefetch=0,
            grid=(num_blocks,),
            in_specs=[pl.BlockSpec((tr, 2 * cw), rowmap)]
                     + [wspec(a) for a in weights],
            out_specs=pl.BlockSpec((tr, 2 * cw), rowmap),
        ),
        compiler_params=pltpu.CompilerParams(
            dimension_semantics=("parallel",),
            # Explicit VMEM budget (tiles + weights here are << 1 MiB; 32 MiB is
            # within the scoped limit on v5e/v6e/v7x and leaves ample headroom).
            vmem_limit_bytes=32 * 1024 * 1024),
    )(xin, *weights)

    out = out[:r]
    c = out[:, :cw].reshape(n, h, ch, wh).transpose(0, 2, 1, 3)
    d = out[:, cw:].reshape(n, h, ch, wh).transpose(0, 2, 1, 3)
    if not horizontal:
        c = jnp.swapaxes(c, 2, 3)
        d = jnp.swapaxes(d, 2, 3)
    return c, d


# ---------------------------------------------------------------------------
# Pure-NumPy reference (direct translation of the PyTorch module, horizontal)
# ---------------------------------------------------------------------------

def _np_branch(z, w1, b1, w2, b2):
    z = np.asarray(z, np.float32)
    w1 = np.asarray(w1, np.float32)
    b1 = np.asarray(b1, np.float32)
    w2 = np.asarray(w2, np.float32)
    b2 = np.asarray(b2, np.float32)
    k = w1.shape[-1]
    pad_l, pad_r = k // 2, k - 1 - k // 2
    left = z[..., 1:pad_l + 1][..., ::-1]
    right = z[..., -1 - pad_r:-1][..., ::-1]
    zp = np.concatenate([left, z, right], axis=-1)
    wo = zp.shape[-1] - k + 1
    hid = np.zeros((z.shape[0], w1.shape[0], z.shape[2], wo), np.float32)
    for j in range(k):
        hid += np.einsum("oi,nihw->nohw", w1[:, :, 0, j], zp[..., j:j + wo])
    hid = np.maximum(hid + b1[None, :, None, None], 0.0)
    out = np.einsum("oi,nihw->nohw", w2[:, :, 0, 0], hid) + b2[None, :, None, None]
    return np.tanh(out)


def _ref_lifting(x, params):
    x = np.asarray(x, np.float32)
    xe = x[:, :, :, 0::2]
    xo = x[:, :, :, 1::2]
    c = xe + _np_branch(xo, params["U"]["w1"], params["U"]["b1"],
                        params["U"]["w2"], params["U"]["b2"])
    d = xo - _np_branch(c, params["P"]["w1"], params["P"]["b1"],
                        params["P"]["w2"], params["P"]["b2"])
    return c, d


if __name__ == "__main__":
    key = jax.random.PRNGKey(0)
    n, ch, h, w = 2, 4, 16, 16        # batch=2, in_planes=4, 16x16 spatial
    k_size = 4
    hid = 2 * ch                      # size_hidden = 2

    def _uniform(k, shape, fan_in):
        bound = 1.0 / math.sqrt(fan_in)
        return jax.random.uniform(k, shape, jnp.float32, -bound, bound)

    keys = jax.random.split(key, 9)
    x = jax.random.normal(keys[0], (n, ch, h, w), dtype=jnp.float32)
    params = {
        "U": dict(w1=_uniform(keys[1], (hid, ch, 1, k_size), ch * k_size),
                  b1=_uniform(keys[2], (hid,), ch * k_size),
                  w2=_uniform(keys[3], (ch, hid, 1, 1), hid),
                  b2=_uniform(keys[4], (ch,), hid)),
        "P": dict(w1=_uniform(keys[5], (hid, ch, 1, k_size), ch * k_size),
                  b1=_uniform(keys[6], (hid,), ch * k_size),
                  w2=_uniform(keys[7], (ch, hid, 1, 1), hid),
                  b2=_uniform(keys[8], (ch,), hid)),
    }

    c_out, d_out = lifting_scheme(x, params, horizontal=True)
    c_out, d_out = jax.block_until_ready((c_out, d_out))

    c_ref, d_ref = _ref_lifting(np.asarray(x), params)
    np.testing.assert_allclose(np.asarray(c_out), c_ref, rtol=1e-2, atol=1e-2)
    np.testing.assert_allclose(np.asarray(d_out), d_ref, rtol=1e-2, atol=1e-2)
    print("KERNEL_OK")
</pallas_src>

<mosaic_0001>
module attributes {stable_mosaic.version = 11 : i64} {
  func.func @_lifting_kernel(%arg0: i32, %arg1: memref<16x64xf32, #tpu.memory_space<vmem>>, %arg2: memref<32x64xf32, #tpu.memory_space<vmem>>, %arg3: memref<1x64xf32, #tpu.memory_space<vmem>>, %arg4: memref<64x32xf32, #tpu.memory_space<vmem>>, %arg5: memref<1x32xf32, #tpu.memory_space<vmem>>, %arg6: memref<32x64xf32, #tpu.memory_space<vmem>>, %arg7: memref<1x64xf32, #tpu.memory_space<vmem>>, %arg8: memref<64x32xf32, #tpu.memory_space<vmem>>, %arg9: memref<1x32xf32, #tpu.memory_space<vmem>>, %arg10: memref<16x64xf32, #tpu.memory_space<vmem>>) attributes {dimension_semantics = [#tpu.dimension_semantics<parallel>], iteration_bounds = array<i64: 2>, scalar_prefetch = 0 : i64, scratch_operands = 0 : i64, tpu.core_type = #tpu.core_type<tc>, window_params = [{transform_indices = @transform_0, window_bounds = array<i64: 16, 64>}, {pipeline_mode = #tpu.pipeline_mode<synchronous>, transform_indices = @transform_1, window_bounds = array<i64: 32, 64>}, {pipeline_mode = #tpu.pipeline_mode<synchronous>, transform_indices = @transform_2, window_bounds = array<i64: 1, 64>}, {pipeline_mode = #tpu.pipeline_mode<synchronous>, transform_indices = @transform_3, window_bounds = array<i64: 64, 32>}, {pipeline_mode = #tpu.pipeline_mode<synchronous>, transform_indices = @transform_4, window_bounds = array<i64: 1, 32>}, {pipeline_mode = #tpu.pipeline_mode<synchronous>, transform_indices = @transform_5, window_bounds = array<i64: 32, 64>}, {pipeline_mode = #tpu.pipeline_mode<synchronous>, transform_indices = @transform_6, window_bounds = array<i64: 1, 64>}, {pipeline_mode = #tpu.pipeline_mode<synchronous>, transform_indices = @transform_7, window_bounds = array<i64: 64, 32>}, {pipeline_mode = #tpu.pipeline_mode<synchronous>, transform_indices = @transform_8, window_bounds = array<i64: 1, 32>}, {transform_indices = @transform_9, window_bounds = array<i64: 16, 64>}]} {
    %c0 = arith.constant 0 : index
    %c0_0 = arith.constant 0 : index
    %0 = vector.load %arg1[%c0, %c0_0] : memref<16x64xf32, #tpu.memory_space<vmem>>, vector<16x64xf32>
    %1 = vector.extract_strided_slice %0 {offsets = [0, 0], sizes = [16, 32], strides = [1, 1]} : vector<16x64xf32> to vector<16x32xf32>
    %2 = vector.extract_strided_slice %0 {offsets = [0, 32], sizes = [16, 32], strides = [1, 1]} : vector<16x64xf32> to vector<16x32xf32>
    %c0_1 = arith.constant 0 : index
    %c0_2 = arith.constant 0 : index
    %3 = vector.load %arg2[%c0_1, %c0_2] : memref<32x64xf32, #tpu.memory_space<vmem>>, vector<32x64xf32>
    %cst = arith.constant dense<0.000000e+00> : vector<16x64xf32>
    %4 = tpu.matmul %2, %3, %cst {dimension_numbers = #tpu.dot_dimension_numbers<[1], [0], [0], [1], [0, 0, 1, 1], [], []>} : vector<16x32xf32>, vector<32x64xf32>, vector<16x64xf32> -> vector<16x64xf32>
    %c0_3 = arith.constant 0 : index
    %c0_4 = arith.constant 0 : index
    %5 = vector.load %arg3[%c0_3, %c0_4] : memref<1x64xf32, #tpu.memory_space<vmem>>, vector<1x64xf32>
    %6 = vector.broadcast %5 : vector<1x64xf32> to vector<16x64xf32>
    %7 = arith.addf %4, %6 : vector<16x64xf32>
    %cst_5 = arith.constant 0.000000e+00 : f32
    %8 = vector.broadcast %cst_5 : f32 to vector<16x64xf32>
    %9 = arith.maximumf %7, %8 : vector<16x64xf32>
    %c0_6 = arith.constant 0 : index
    %c0_7 = arith.constant 0 : index
    %10 = vector.load %arg4[%c0_6, %c0_7] : memref<64x32xf32, #tpu.memory_space<vmem>>, vector<64x32xf32>
    %cst_8 = arith.constant dense<0.000000e+00> : vector<16x32xf32>
    %11 = tpu.matmul %9, %10, %cst_8 {dimension_numbers = #tpu.dot_dimension_numbers<[1], [0], [0], [1], [0, 0, 1, 1], [], []>} : vector<16x64xf32>, vector<64x32xf32>, vector<16x32xf32> -> vector<16x32xf32>
    %c0_9 = arith.constant 0 : index
    %c0_10 = arith.constant 0 : index
    %12 = vector.load %arg5[%c0_9, %c0_10] : memref<1x32xf32, #tpu.memory_space<vmem>>, vector<1x32xf32>
    %13 = vector.broadcast %12 : vector<1x32xf32> to vector<16x32xf32>
    %14 = arith.addf %11, %13 : vector<16x32xf32>
    %15 = math.tanh %14 : vector<16x32xf32>
    %16 = arith.addf %1, %15 : vector<16x32xf32>
    %c0_11 = arith.constant 0 : index
    %c0_12 = arith.constant 0 : index
    %17 = vector.load %arg6[%c0_11, %c0_12] : memref<32x64xf32, #tpu.memory_space<vmem>>, vector<32x64xf32>
    %cst_13 = arith.constant dense<0.000000e+00> : vector<16x64xf32>
    %18 = tpu.matmul %16, %17, %cst_13 {dimension_numbers = #tpu.dot_dimension_numbers<[1], [0], [0], [1], [0, 0, 1, 1], [], []>} : vector<16x32xf32>, vector<32x64xf32>, vector<16x64xf32> -> vector<16x64xf32>
    %c0_14 = arith.constant 0 : index
    %c0_15 = arith.constant 0 : index
    %19 = vector.load %arg7[%c0_14, %c0_15] : memref<1x64xf32, #tpu.memory_space<vmem>>, vector<1x64xf32>
    %20 = vector.broadcast %19 : vector<1x64xf32> to vector<16x64xf32>
    %21 = arith.addf %18, %20 : vector<16x64xf32>
    %cst_16 = arith.constant 0.000000e+00 : f32
    %22 = vector.broadcast %cst_16 : f32 to vector<16x64xf32>
    %23 = arith.maximumf %21, %22 : vector<16x64xf32>
    %c0_17 = arith.constant 0 : index
    %c0_18 = arith.constant 0 : index
    %24 = vector.load %arg8[%c0_17, %c0_18] : memref<64x32xf32, #tpu.memory_space<vmem>>, vector<64x32xf32>
    %cst_19 = arith.constant dense<0.000000e+00> : vector<16x32xf32>
    %25 = tpu.matmul %23, %24, %cst_19 {dimension_numbers = #tpu.dot_dimension_numbers<[1], [0], [0], [1], [0, 0, 1, 1], [], []>} : vector<16x64xf32>, vector<64x32xf32>, vector<16x32xf32> -> vector<16x32xf32>
    %c0_20 = arith.constant 0 : index
    %c0_21 = arith.constant 0 : index
    %26 = vector.load %arg9[%c0_20, %c0_21] : memref<1x32xf32, #tpu.memory_space<vmem>>, vector<1x32xf32>
    %27 = vector.broadcast %26 : vector<1x32xf32> to vector<16x32xf32>
    %28 = arith.addf %25, %27 : vector<16x32xf32>
    %29 = math.tanh %28 : vector<16x32xf32>
    %30 = arith.subf %2, %29 : vector<16x32xf32>
    %31 = tpu.concatenate %16, %30 in 1 : vector<16x32xf32>, vector<16x32xf32> -> vector<16x64xf32>
    %c0_22 = arith.constant 0 : index
    %c0_23 = arith.constant 0 : index
    %32 = vector.load %arg10[%c0_22, %c0_23] : memref<16x64xf32, #tpu.memory_space<vmem>>, vector<16x64xf32>
    tpu.vector_store %arg10[%c0_22, %c0_23], %31 {strides = array<i32>} : memref<16x64xf32, #tpu.memory_space<vmem>>, vector<16x64xf32>,
    return
  }
  func.func @transform_0(%arg0: i32) -> (i32, i32) {
    %c0_i32 = arith.constant 0 : i32
    %c0_i32_0 = arith.constant 0 : i32
    return %arg0, %c0_i32 : i32, i32
  }
  func.func @transform_1(%arg0: i32) -> (i32, i32) {
    %c0_i32 = arith.constant 0 : i32
    %c0_i32_0 = arith.constant 0 : i32
    %c0_i32_1 = arith.constant 0 : i32
    return %c0_i32, %c0_i32_0 : i32, i32
  }
  func.func @transform_2(%arg0: i32) -> (i32, i32) {
    %c0_i32 = arith.constant 0 : i32
    %c0_i32_0 = arith.constant 0 : i32
    %c0_i32_1 = arith.constant 0 : i32
    return %c0_i32, %c0_i32_0 : i32, i32
  }
  func.func @transform_3(%arg0: i32) -> (i32, i32) {
    %c0_i32 = arith.constant 0 : i32
    %c0_i32_0 = arith.constant 0 : i32
    %c0_i32_1 = arith.constant 0 : i32
    return %c0_i32, %c0_i32_0 : i32, i32
  }
  func.func @transform_4(%arg0: i32) -> (i32, i32) {
    %c0_i32 = arith.constant 0 : i32
    %c0_i32_0 = arith.constant 0 : i32
    %c0_i32_1 = arith.constant 0 : i32
    return %c0_i32, %c0_i32_0 : i32, i32
  }
  func.func @transform_5(%arg0: i32) -> (i32, i32) {
    %c0_i32 = arith.constant 0 : i32
    %c0_i32_0 = arith.constant 0 : i32
    %c0_i32_1 = arith.constant 0 : i32
    return %c0_i32, %c0_i32_0 : i32, i32
  }
  func.func @transform_6(%arg0: i32) -> (i32, i32) {
    %c0_i32 = arith.constant 0 : i32
    %c0_i32_0 = arith.constant 0 : i32
    %c0_i32_1 = arith.constant 0 : i32
    return %c0_i32, %c0_i32_0 : i32, i32
  }
  func.func @transform_7(%arg0: i32) -> (i32, i32) {
    %c0_i32 = arith.constant 0 : i32
    %c0_i32_0 = arith.constant 0 : i32
    %c0_i32_1 = arith.constant 0 : i32
    return %c0_i32, %c0_i32_0 : i32, i32
  }
  func.func @transform_8(%arg0: i32) -> (i32, i32) {
    %c0_i32 = arith.constant 0 : i32
    %c0_i32_0 = arith.constant 0 : i32
    %c0_i32_1 = arith.constant 0 : i32
    return %c0_i32, %c0_i32_0 : i32, i32
  }
  func.func @transform_9(%arg0: i32) -> (i32, i32) {
    %c0_i32 = arith.constant 0 : i32
    %c0_i32_0 = arith.constant 0 : i32
    return %arg0, %c0_i32 : i32, i32
  }
}

</mosaic_0001>

<bundles_post_ra>
// kernel: tpu_custom_call.1
= control target key start
LH: loop header
LB: loop body
LE: loop exit
PB: predicated region body
PF: predicated region fallthrough
CT: control target
= control target key end

     0   :  { %14 = vsyncpa [#allocation3], 0  ;;  %s1361_s0 = inlined_call_operand.vmem [shape: f32[32,64], index: 0, kind: input, shape index: {}]   ;;  %s1362_s1 = inlined_call_operand.vmem [shape: f32[32,64], index: 1, kind: input, shape index: {}]   ;;  %s1363_s2 = inlined_call_operand.vmem [shape: f32[1,64], index: 2, kind: input, shape index: {}]   ;;  %s1364_s3 = inlined_call_operand.vmem [shape: f32[64,32], index: 3, kind: input, shape index: {}]   ;;  %s1365_s4 = inlined_call_operand.vmem [shape: f32[1,32], index: 4, kind: input, shape index: {}]   ;;  %s1366_s5 = inlined_call_operand.vmem [shape: f32[32,64], index: 5, kind: input, shape index: {}]   ;;  %s1367_s6 = inlined_call_operand.vmem [shape: f32[1,64], index: 6, kind: input, shape index: {}]   ;;  %s1368_s7 = inlined_call_operand.vmem [shape: f32[64,32], index: 7, kind: input, shape index: {}]   ;;  %s1369_s8 = inlined_call_operand.vmem [shape: f32[1,32], index: 8, kind: input, shape index: {}]   ;;  %s1370_s9 = inlined_call_operand.hbm [shape: f32[32,64], index: 9, kind: output, shape index: {}]  }
   0x1   :  { %16 = vsyncpa [#allocation3 + $0x1], 0  ;;  %s1153_s30 = smov 0   ;;  %s1155_s10 = smov 0  }
   0x2   :  { %s1157_s11 = smov 0   ;;  %s1159_s12 = smov 0  }
   0x3 LB: > { %s1174_s13 = sadd.s32 4294967295, %s1096_s12   ;;  %s818_s14 = sadd.s32 4294967294, %s1096_s12   ;;  %s1096_s12 = sphi %s1159_s12, %s1376_s12   ;;  %s1092_s11 = sphi %s1157_s11, %s1375_s11   ;;  %s1088_s10 = sphi %s1155_s10, %s1374_s10   ;;  %s1084_s30 = sphi %s1153_s30, %s1373_s30  }
   0x4   : > { %s1178_s15 = sadd.s32 1, %s1096_s12   ;;  %s223_s16 = sadd.s32 1, %s1092_s11 }
   0x5   : > { %s220_s17 = ssub.s32 %s1096_s12, %s1178_s15  ;;  %p233_p0 = scmp.ne.s32.totalorder %s1092_s11, %s1088_s10 }
   0x6   : > { %p221_p1 = scmp.eq.s32.totalorder %s220_s17, 0  ;;  %p234_p2 = scmp.eq.s32.totalorder %s1174_s13, 1 }
   0x7   : > { %p239_p3 = scmp.ne.s32.totalorder %s1088_s10, %s1084_s30  ;;  %p240_p4 = scmp.eq.s32.totalorder %s818_s14, 1 }
   0x8   : > { %s1189_s18 = scalar_select %p221_p1, %s1092_s11, %s223_s16  }
   0x9   : > { %p1191_p5 = por %p234_p2, %p233_p0  ;;  %p1195_p6 = por %p240_p4, %p239_p3 }
   0xa   : > { %p821_p7 = scmp.ge.s32.totalorder %s1096_s12, 1  ;;  %p291_p8 = scmp.lt.s32.totalorder %s1096_s12, 3 }
   0xc   : > { %p292_p9 = pnand %p821_p7, %p291_p8 }
   0xd   : > { %s823_s21 = sshll.u32 (!%p292_p9), %s1174_s13, 1  ;;  %v336_v0 = vld [vmem:[%s1362_s1] sm:$0xff] (!%p292_p9)  ;;  %v337_v1 = vld [vmem:[%s1362_s1 + $0x8] sm:$0xff] (!%p292_p9)  ;;  %v338_v2 = vld [vmem:[%s1362_s1 + $0x10] sm:$0xff] (!%p292_p9)  ;;  %s1098_s27 = smov (!%p292_p9), 96   ;;  %vm353_vm0 = vcmask (!%p292_p9), 261120  }
   0xe   : > { %295 = sbr.rel (%p292_p9) target bundleno = 1172 (0x494), region = 56  ;;  %p328_p10 = scmp.lt.s32.totalorder (!%p292_p9), %s823_s21, 3  ;;  %v935_v3 = vpack.c.bf16 (!%p292_p9), %v337_v1, %v336_v0  ;;  %v339_v4 = vld [vmem:[%s1362_s1 + $0x18] sm:$0xff] (!%p292_p9)  ;;  %v435_v6 = vld [vmem:[%s1364_s3] sm:$0xff] (!%p292_p9)  ;;  %v436_v7 = vld [vmem:[%s1364_s3 + $0x8] sm:$0xff] (!%p292_p9)  ;;  %vm450_vm1 = vcmask (!%p292_p9), 523264  }
   0xf   : > { %v939_v5 = vpack.c.bf16 (!%p292_p9), %v339_v4, %v338_v2  ;;  %v943_v8 = vpack.c.bf16 (!%p292_p9), %v436_v7, %v435_v6  ;;  %v437_v12 = vld [vmem:[%s1364_s3 + $0x10] sm:$0xff] (!%p292_p9)  ;;  %v438_v13 = vld [vmem:[%s1364_s3 + $0x18] sm:$0xff] (!%p292_p9)  ;;  %v439_v16 = vld [vmem:[%s1364_s3 + $0x20] sm:$0xff] (!%p292_p9)  ;;  %s1099_s24 = smov (!%p292_p9), 32   ;;  %s324_s25 = sand.u32 (!%p292_p9), 1, %s1088_s10  }
  0x10   : > { %936 = vmatprep.subr.bf16.mxu1 (!%p292_p9), %v935_v3  ;;  %v947_v14 = vpack.c.bf16 (!%p292_p9), %v438_v13, %v437_v12  ;;  %v440_v17 = vld [vmem:[%s1364_s3 + $0x28] sm:$0xff] (!%p292_p9)  ;;  %v441_v19 = vld [vmem:[%s1364_s3 + $0x30] sm:$0xff] (!%p292_p9)  ;;  %v442_v20 = vld [vmem:[%s1364_s3 + $0x38] sm:$0xff] (!%p292_p9)  ;;  %s842_s28 = sshll.u32 (!%p292_p9), %s1174_s13, 8  ;;  %s1320_s13 = scalar_lea.sflag (!%p292_p9), [#allocation3], %s324_s25 }
  0x11   : > { %938 = vmatpush3.bf16.msra.mxu1 (!%p292_p9), %v935_v3  ;;  %v951_v18 = vpack.c.bf16 (!%p292_p9), %v440_v17, %v439_v16  ;;  %v955_v21 = vpack.c.bf16 (!%p292_p9), %v442_v20, %v441_v19  ;;  %v825_v22 = vld [vmem:[%s1363_s2] ss:$0 sm:$0xff] (!%p292_p9)  ;;  %v537_v30 = vld [vmem:[%s1366_s5 + $0x8] sm:$0xff] (!%p292_p9)  ;;  %v538_v31 = vld [vmem:[%s1366_s5 + $0x10] sm:$0xff] (!%p292_p9)  ;;  %s1314_s16 = scalar_lea.hbm (!%p292_p9), %s1370_s9, %s842_s28  ;;  %s1100_s22 = smov (!%p292_p9), [#allocation2]  }
  0x12   : > { %940 = vmatprep.subr.bf16.mxu1 (!%p292_p9), %v939_v5  ;;  %v536_v29 = vld [vmem:[%s1366_s5] sm:$0xff] (!%p292_p9)  ;;  %v539_v33 = vld [vmem:[%s1366_s5 + $0x18] sm:$0xff] (!%p292_p9)  ;;  %v631_v36 = vld [vmem:[%s1368_s7 + $0x8] sm:$0xff] (!%p292_p9) }
  0x13   : > { %v959_v32 = vpack.c.bf16 (!%p292_p9), %v537_v30, %v536_v29  ;;  %v963_v34 = vpack.c.bf16 (!%p292_p9), %v539_v33, %v538_v31  ;;  %v630_v35 = vld [vmem:[%s1368_s7] sm:$0xff] (!%p292_p9)  ;;  %v632_v44 = vld [vmem:[%s1368_s7 + $0x10] sm:$0xff] (!%p292_p9)  ;;  %v633_v45 = vld [vmem:[%s1368_s7 + $0x18] sm:$0xff] (!%p292_p9) }
  0x14   : > { %v967_v37 = vpack.c.bf16 (!%p292_p9), %v631_v36, %v630_v35  ;;  %v828_v38 = vld [vmem:[%s1365_s4] ss:$0 sm:$0xff] (!%p292_p9)  ;;  %v971_v49 = vpack.c.bf16 (!%p292_p9), %v633_v45, %v632_v44  ;;  %v635_v51 = vld [vmem:[%s1368_s7 + $0x28] sm:$0xff] (!%p292_p9)  ;;  %v636_v53 = vld [vmem:[%s1368_s7 + $0x30] sm:$0xff] (!%p292_p9) }
  0x15   : > { %s1378_s21 = smov (!%p328_p10, %s823_s21), 3  ;;  %942 = vmatpush3.bf16.msra.mxu1 %v939_v5  ;;  %960 = vmatprep.subr.bf16.mxu0 %v959_v32  ;;  %v634_v50 = vld [vmem:[%s1368_s7 + $0x20] sm:$0xff]  ;;  %v637_v54 = vld [vmem:[%s1368_s7 + $0x38] sm:$0xff] }
  0x16   : > { %s824_s23 = sshll.u32 %s1378_s21, 3  ;;  %944 = vmatprep.subr.bf16.mxu1 %v943_v8  ;;  %962 = vmatpush3.bf16.msra.mxu0 %v959_v32  ;;  %v975_v52 = vpack.c.bf16 %v635_v51, %v634_v50  ;;  %v979_v55 = vpack.c.bf16 %v637_v54, %v636_v53  ;;  %v831_v56 = vld [vmem:[%s1367_s6] ss:$0 sm:$0xff] }
  0x17   : > { %s331_s26 = scalar_lea.vmem %s1361_s0, %s824_s23  ;;  %964 = vmatprep.subr.bf16.mxu0 %v963_v34  ;;  %v834_v63 = vld [vmem:[%s1369_s8] ss:$0 sm:$0xff]  ;;  %s1038_s23 = sshll.u32 %s1100_s22, 4  ;;  %s1039_s23 = int_to_ptr.vmem [resolvable:$false] %s1038_s23 }
  0x18   : > { %v1223_v9 = vld [vmem:[%s331_s26] sm:$0xff]  ;;  %v1226_v10 = vld [vmem:[%s331_s26 + $0x8] sm:$0xff]  ;;  %s822_s26 = sshll.u32 %s324_s25, 4 }
  0x19   : > { %349 = vrot.lane.b32.xlu0 %v1223_v9, %s1098_s27 }
  0x1a   : > { %966 = vmatpush3.bf16.msra.mxu0 %v963_v34 }
  0x1b   : > { %968 = vmatprep.subr.bf16.mxu0 %v967_v37 }
  0x1d   : > { %351 = vrot.lane.b32.xlu0 %v1226_v10, %s1098_s27  ;;  %s326_s27 = scalar_lea.vmem [#allocation2], %s822_s26 }
  0x1e   : > { %s756_s21 = sshll.u32 %s326_s27, 4  ;;  %s1316_s21 = int_to_ptr.vmem [resolvable:$true] %s756_s21 }
  0x1f   : > { %s1034_s17 = scalar_lea.vmem %s1316_s21, 256  ;;  %p1041_p0 = scmp.lt.s32.totalorder %s1316_s21, %s1039_s23 }
  0x20   : > { %p1035_p11 = scmp.ne.s32.totalorder %s1316_s21, %s1034_s17 }
  0x22   : > { %p1036_p12 = pnand %p1035_p11, %p1191_p5 }
  0x24   : > { %p1037_p13 = pneg %p1036_p12 }
  0x8b   : > { %v350_v11 = vpop.permute.xlu0 %349 }
  0x8c   : > { %883 = vmatprep.mubr.msk.f32.mxu1 %vm353_vm0, %v350_v11 }
  0x8f   : > { %v352_v15 = vpop.permute.xlu0 %351 }
  0x90   : > { %884 = vmatmul.mubr.msk.f32.vlgmr.msra.gmra.mrb[0].mxu1 %vm353_vm0, %v352_v15 }
  0x91   : > { %946 = vmatpush3.bf16.msra.mxu1 %v943_v8 }
  0x92   : > { %948 = vmatprep.subr.bf16.mxu1 %v947_v14 }
  0x95   : > { %950 = vmatpush3.bf16.msra.mxu1 %v947_v14 }
  0x96   : > { %952 = vmatprep.subr.bf16.mxu1 %v951_v18 }
  0x99   : > { %954 = vmatpush3.bf16.msra.mxu1 %v951_v18 }
  0x9a   : > { %956 = vmatprep.subr.bf16.mxu1 %v955_v21 }
  0x9d   : > { %958 = vmatpush3.bf16.msra.mxu1 %v955_v21 }
 0x163   : > { %v885_v23 = vpop.f32.mrb[0].mxu1 }
 0x164   : > { %v430_v24 = vadd.f32 %v885_v23, %v825_v22  ;;  %v424_v25 = vpop.f32.mrb[1].mxu1 }
 0x165   : > { %v425_v26 = vadd.f32 %v825_v22, %v424_v25 }
 0x166   : > { %v434_v28 = vmax.f32 %v430_v24, 0.0 }
 0x167   : > { %v433_v27 = vmax.f32 %v425_v26, 0.0 }
 0x169   : > { %902 = vmatprep.mubr.msk.f32.mxu1 %vm450_vm1, %v433_v27 }
 0x16a   : > { %903 = vmatmul.mubr.msk.f32.vlgmr.msra.gmra.mrb[2].mxu1 %vm450_vm1, %v434_v28 }
 0x23d   : > { %v904_v39 = vpop.f32.mrb[2].mxu1 }
 0x23e   : > { %v529_v40 = vadd.f32 %v904_v39, %v828_v38  ;;  %v523_v41 = vpop.f32.mrb[3].mxu1 }
 0x23f   : > { %v524_v42 = vadd.f32 %v828_v38, %v523_v41 }
 0x240   : > { %1026 = vtanh.f32 %v529_v40 }
 0x241   : > { %1028 = vtanh.f32 %v524_v42 }
 0x24a   : > { %v1027_v43 = vpop.eup %1026 }
 0x24b   : > { %v1029_v46 = vpop.eup %1028  ;;  %v535_v48 = vadd.f32 %v1027_v43, %v1226_v10 }
 0x24c   : > { %v534_v47 = vadd.f32 %v1029_v46, %v1223_v9 }
 0x24e   : > { %913 = vmatprep.mubr.msk.f32.mxu0 %vm353_vm0, %v534_v47 }
 0x24f   : > { %914 = vmatmul.mubr.msk.f32.vlgmr.msra.gmra.mrb[0].mxu0 %vm353_vm0, %v535_v48 }
 0x250   : > { %970 = vmatpush3.bf16.msra.mxu0 %v967_v37 }
 0x251   : > { %972 = vmatprep.subr.bf16.mxu0 %v971_v49 }
 0x254   : > { %974 = vmatpush3.bf16.msra.mxu0 %v971_v49 }
 0x255   : > { %976 = vmatprep.subr.bf16.mxu0 %v975_v52 }
 0x258   : > { %978 = vmatpush3.bf16.msra.mxu0 %v975_v52 }
 0x259   : > { %980 = vmatprep.subr.bf16.mxu0 %v979_v55 }
 0x25c   : > { %982 = vmatpush3.bf16.msra.mxu0 %v979_v55 }
 0x322   : > { %v915_v57 = vpop.f32.mrb[0].mxu0 }
 0x323   : > { %v625_v58 = vadd.f32 %v915_v57, %v831_v56  ;;  %v619_v59 = vpop.f32.mrb[1].mxu0 }
 0x324   : > { %v620_v60 = vadd.f32 %v831_v56, %v619_v59 }
 0x325   : > { %v629_v62 = vmax.f32 %v625_v58, 0.0 }
 0x326   : > { %v628_v61 = vmax.f32 %v620_v60, 0.0 }
 0x328   : > { %932 = vmatprep.mubr.msk.f32.mxu0 %vm450_vm1, %v628_v61 }
 0x329   : > { %933 = vmatmul.mubr.msk.f32.vlgmr.msra.gmra.mrb[2].mxu0 %vm450_vm1, %v629_v62 }
 0x3fc   : > { %v934_v0 = vpop.f32.mrb[2].mxu0 }
 0x3fd   : > { %v717_v1 = vpop.f32.mrb[3].mxu0  ;;  %v723_v3 = vadd.f32 %v934_v0, %v834_v63 }
 0x3fe   : > { %v718_v2 = vadd.f32 %v834_v63, %v717_v1 }
 0x400   : > { %1030 = vtanh.f32 %v718_v2 }
 0x401   : > { %1032 = vtanh.f32 %v723_v3 }
 0x40a   : > { %v1031_v4 = vpop.eup %1030 }
 0x40b   : > { %730 = vrot.lane.b32.xlu1 %v1031_v4, %s1099_s24  ;;  %v1033_v5 = vpop.eup %1032 }
 0x40f   : > { %732 = vrot.lane.b32.xlu1 %v1033_v5, %s1099_s24  ;;  %s1040_s24 = scalar_lea.vmem %s1039_s23, 512 }
 0x410   : > { %p1042_p1 = scmp.lt.s32.totalorder %s1040_s24, %s1034_s17 }
 0x412   : > { %p1043_p2 = por %p1042_p1, %p1041_p0 }
 0x414   : > { %p1044_p3 = pnand %p1043_p2, %p1037_p13 }
 0x47d   : > { %v731_v6 = vpop.permute.xlu1 %730 }
 0x47e   : > { %v736_v7 = vsub.f32 %v1223_v9, %v731_v6 }
 0x480   : > { %v738_v8 = vsel %vm353_vm0, %v534_v47, %v736_v7 }
 0x481   : > { %740 = vst.msk [vmem:[%s326_s27] sm:$0xff] %vm450_vm1, %v738_v8  ;;  %v733_v11 = vpop.permute.xlu1 %732 }
 0x482   : > { %v737_v12 = vsub.f32 %v1226_v10, %v733_v11 }
 0x484   : > { %v739_v9 = vsel %vm353_vm0, %v535_v48, %v737_v12 }
 0x485   : > { %741 = vst.msk [vmem:[%s326_s27 + $0x8] sm:$0xff] %vm450_vm1, %v739_v9 }
 0x486   : > { %1047 = shalt.err (!%p1044_p3)
}
 0x487   : > { %s1048_s25 = scalar_lea.hbm %s1314_s16, 256  ;;  %s1052_s28 = scalar_lea.hbm %s1370_s9, 512 }
 0x488   : > { %p1049_p4 = scmp.ne.s32.totalorder %s1314_s16, %s1048_s25  ;;  %p1053_p9 = scmp.lt.u32.totalorder %s1314_s16, %s1370_s9 }
 0x489   : > { %p1054_p10 = scmp.lt.u32.totalorder %s1052_s28, %s1048_s25  ;;  %p1056_p12 = scmp.lt.u32.totalorder %s1048_s25, %s1314_s16 }
 0x48a   : > { %p1050_p7 = pnand %p1049_p4, %p1191_p5 }
 0x48b   : > { %p1055_p11 = por %p1054_p10, %p1053_p9 }
 0x48c   : > { %p1051_p8 = pneg %p1050_p7 }
 0x48d   : > { %p1057_p13 = por %p1056_p12, %p1055_p11 }
 0x48f   : > { %p1058_p0 = pnand %p1057_p13, %p1051_p8 }
 0x491   : > { %1061 = shalt.err (!%p1058_p0)
}
 0x492   : > { %s1101_s17 = smov 128   ;;  %s1102_s22 = smov 8  }
 0x493   : > { %983 = dma.vmem_to_hbm [thread:$0]  (%p1191_p5), %s1316_s21, 256, %s1314_s16, %s1320_s13, %s1101_s17, %s1101_s17, %s1102_s22  }
 0x494 PF: > { %p989_p1 = scmp.ge.s32.totalorder %s1096_s12, 2  ;;  %s771_s23 = sand.u32 1, %s1084_s30  }
 0x495   : > { %s772_s24 = scalar_lea.sflag [#allocation3], %s771_s23 }
 0x496   : > { %p986_p2 = pnand %p989_p1, %p1195_p6 }
 0x498   : > { %1079 = dma.done.wait (!%p986_p2), %s772_s24, 256  }
 0x499   : > { %1081 = vsyncadd (!%p986_p2), %s772_s24, 4294967040  ;;  %p19_p3 = scmp.ge.s32.totalorder %s1178_s15, 4   ;;  %s1373_s30 = smov %s1088_s10 }
 0x49a   : > { %s1374_s10 = smov %s1092_s11  ;;  %s1375_s11 = smov %s1189_s18 }
 0x49b   : > { %s1376_s12 = smov %s1178_s15  ;;  %21 = sbr.rel (!%p19_p3) target bundleno = 3 (0x3), region = 91 }
 0x4a2   :  { %777 = vsyncpa [#allocation3], 1 }
 0x4a3   :  { %779 = vsyncpa [#allocation3 + $0x1], 1 }

</bundles_post_ra>
